<compile_context>
chip_gen: v7x
topology: tpu7x:2x2x1
jax: 0.10.0
libtpu: 0.0.40
codegen_flags: <defaults>
</compile_context>

<pallas_src>
import jax
import jax.numpy as jnp
import numpy as np
from jax import lax
from jax.experimental import pallas as pl
from jax.experimental.pallas import tpu as pltpu

_LANE = 128
_SUBLANE = 8


def _round_up(n, m):
    return ((n + m - 1) // m) * m


def _folded_kernel(x_ref, w_ref, b_ref, o_ref):
    # x_ref: (TB, H) pooler-output tile, native dtype (f32 or bf16, no cast).
    # w_ref: (1, H)  folded weight row W1 @ W2, float32 in HBM.
    # b_ref: (1,)    folded bias (SMEM scalar).
    # o_ref: (1, 1, TB) lane-dense score row for this tile.
    x = x_ref[...]
    w = w_ref[...].astype(x.dtype)
    # (1,H) . (TB,H)^T -> (1,TB): one MXU GEMV, f32 accumulation, lane-dense
    # result; no full-tile f32 upcast temp even when x is bf16.
    acc = lax.dot_general(w, x, (((1,), (1,)), ((), ())),
                          preferred_element_type=jnp.float32)
    o_ref[...] = (acc + b_ref[0]).reshape(o_ref.shape).astype(o_ref.dtype)


def _unfolded_kernel(x_ref, w1_ref, b1_ref, w2_ref, b2_ref, o_ref):
    # Reference-order path: Linear(H,256) on the MXU, then the N=1 second
    # linear as a lane-dense (1,256).(TB,256)^T GEMV.
    h = jnp.dot(x_ref[...], w1_ref[...].astype(x_ref.dtype),
                preferred_element_type=jnp.float32)
    h = h + b1_ref[...]
    out = lax.dot_general(w2_ref[...], h, (((1,), (1,)), ((), ())),
                          preferred_element_type=jnp.float32)
    o_ref[...] = (out + b2_ref[0]).reshape(o_ref.shape).astype(o_ref.dtype)


def tapas_score_head(x, w1, b1, w2, b2, *, tb=2048, fold=True):
    """TAPAS scoring head: dropout(eval)=id -> Linear(H,256) -> Linear(256,1).

    x:  (B, H) pooler_output (f32 or bf16 — consumed as-is, no wrapper cast)
    w1: (H, 256) pre-transposed linear1 weight, b1: (256,)
    w2: (256, 1) pre-transposed linear2 weight, b2: (1,)
    Returns (B, 1) float32 scores.
    """
    B, H = x.shape
    H1 = w1.shape[1]
    assert w1.shape == (H, H1) and w2.shape == (H1, 1)
    assert H % _LANE == 0, "hidden size must be a multiple of 128"

    b1f = b1.reshape(1, H1).astype(jnp.float32)
    b2f = jnp.asarray(b2, jnp.float32).reshape(1)
    w2f = w2.astype(jnp.float32)

    # Batch tiling: large tile amortizes the ~0.35us/step grid overhead, capped
    # at ceil(B/2) (rounded to a sublane multiple) so v7x's two TensorCores
    # each get a block.  No padding of x: the ragged last block reads past B
    # (rows are independent; the corresponding output rows are sliced off).
    tb = _round_up(max(int(tb), _SUBLANE), _SUBLANE)
    tb = min(tb, _round_up(max(pl.cdiv(B, 2), 1), _SUBLANE))
    n_blocks = pl.cdiv(B, tb)

    cparams = pltpu.CompilerParams(
        dimension_semantics=("parallel",),   # v7x: shard batch over 2 TCs
        vmem_limit_bytes=32 * 1024 * 1024,   # covers 2 buffers of the x tile
    )
    x_spec = pl.BlockSpec((tb, H), lambda i: (i, 0))
    out_shape = jax.ShapeDtypeStruct((n_blocks, 1, tb), jnp.float32)
    out_spec = pl.BlockSpec((1, 1, tb), lambda i: (i, 0, 0))   # lane-dense

    if fold:
        # Fold the two bias-only linears (dropout is identity in eval):
        # w_eff = W1 @ W2, b_eff = b1 @ W2 + b2.  Kept float32 in HBM.
        hp = lax.Precision.HIGHEST
        w_eff = jnp.dot(w1.astype(jnp.float32), w2f, precision=hp).reshape(1, H)
        b_eff = jnp.dot(b1f, w2f, precision=hp).reshape(1) + b2f

        cost = pl.CostEstimate(
            flops=2 * B * H,
            transcendentals=0,
            bytes_accessed=B * H * x.dtype.itemsize + H * 4 + B * 4,
        )
        out = pl.pallas_call(
            _folded_kernel,
            out_shape=out_shape,
            grid_spec=pl.GridSpec(
                grid=(n_blocks,),
                in_specs=[
                    x_spec,
                    pl.BlockSpec((1, H), lambda i: (0, 0)),
                    pl.BlockSpec(memory_space=pltpu.MemorySpace.SMEM),
                ],
                out_specs=out_spec,
            ),
            compiler_params=cparams,
            cost_estimate=cost,
        )(x, w_eff, b_eff)
    else:
        # Unfolded path: reference-exact accumulation order (needed if dropout
        # between the linears is ever active).
        w2_row = w2f.reshape(1, H1)
        cost = pl.CostEstimate(
            flops=2 * B * H * H1 + 2 * B * H1,
            transcendentals=0,
            bytes_accessed=(B * H * x.dtype.itemsize
                            + H * H1 * w1.dtype.itemsize
                            + 2 * H1 * 4 + B * 4),
        )
        out = pl.pallas_call(
            _unfolded_kernel,
            out_shape=out_shape,
            grid_spec=pl.GridSpec(
                grid=(n_blocks,),
                in_specs=[
                    x_spec,
                    pl.BlockSpec((H, H1), lambda i: (0, 0)),
                    pl.BlockSpec((1, H1), lambda i: (0, 0)),
                    pl.BlockSpec((1, H1), lambda i: (0, 0)),
                    pl.BlockSpec(memory_space=pltpu.MemorySpace.SMEM),
                ],
                out_specs=out_spec,
            ),
            compiler_params=cparams,
            cost_estimate=cost,
        )(x, w1, b1f, w2_row, b2f)

    # (n_blocks, 1, tb) lane-dense rows -> (B, 1) column (tail rows discarded).
    return out.reshape(n_blocks * tb)[:B].reshape(B, 1)


if __name__ == "__main__":
    # Small, deterministic shapes standing in for TAPAS (hidden_size=768 -> 128).
    B, H, H1 = 8, 128, 256

    key = jax.random.PRNGKey(0)
    kx, kw1, kb1, kw2, kb2, kx2 = jax.random.split(key, 6)

    # Deterministic "pooler_output" and PyTorch-Linear-style uniform init.
    x = jax.random.normal(kx, (B, H), dtype=jnp.float32)

    lim1 = 1.0 / (H ** 0.5)
    w1 = jax.random.uniform(kw1, (H, H1), minval=-lim1, maxval=lim1,
                            dtype=jnp.float32)
    b1 = jax.random.uniform(kb1, (H1,), minval=-lim1, maxval=lim1,
                            dtype=jnp.float32)

    lim2 = 1.0 / (H1 ** 0.5)
    w2 = jax.random.uniform(kw2, (H1, 1), minval=-lim2, maxval=lim2,
                            dtype=jnp.float32)
    b2 = jax.random.uniform(kb2, (1,), minval=-lim2, maxval=lim2,
                            dtype=jnp.float32)

    # High-precision numpy reference (dropout in eval mode == identity).
    def ref_np(xa):
        xn = np.asarray(xa, np.float64)
        w1n = np.asarray(w1, np.float64)
        b1n = np.asarray(b1, np.float64)
        w2n = np.asarray(w2, np.float64)
        b2n = np.asarray(b2, np.float64)
        return (xn @ w1n + b1n[None, :]) @ w2n + b2n[None, :]

    ref = ref_np(x)

    # 1) Folded f32 path (default, fastest).
    out = jax.block_until_ready(tapas_score_head(x, w1, b1, w2, b2))
    assert out.shape == (B, 1)
    assert np.allclose(np.asarray(out, np.float64), ref, atol=1e-3, rtol=1e-3)

    # 2) Unfolded path (reference accumulation order).
    out_u = jax.block_until_ready(
        tapas_score_head(x, w1, b1, w2, b2, fold=False))
    assert out_u.shape == (B, 1)
    assert np.allclose(np.asarray(out_u, np.float64), ref, atol=1e-3, rtol=1e-3)

    # 3) Natively-bf16 pooler output (no wrapper-side cast inside the head;
    #    w_eff stays f32 in HBM, cast to bf16 only inside the kernel).
    x_bf16 = x.astype(jnp.bfloat16)
    out_bf = jax.block_until_ready(tapas_score_head(x_bf16, w1, b1, w2, b2))
    assert out_bf.shape == (B, 1)
    assert np.allclose(np.asarray(out_bf, np.float64), ref, atol=5e-2, rtol=5e-2)

    # 4) Ragged batch (B not a multiple of the tile): last block reads past B,
    #    tail rows are discarded by the wrapper slice (no wrapper-side pad).
    B2 = 10
    x2 = jax.random.normal(kx2, (B2, H), dtype=jnp.float32)
    out2 = jax.block_until_ready(tapas_score_head(x2, w1, b1, w2, b2))
    assert out2.shape == (B2, 1)
    assert np.allclose(np.asarray(out2, np.float64), ref_np(x2),
                       atol=1e-3, rtol=1e-3)

    print("KERNEL_OK")
</pallas_src>

<mosaic_0001>
module attributes {stable_mosaic.version = 11 : i64} {
  func.func @_folded_kernel(%arg0: i32, %arg1: memref<8x128xf32, #tpu.memory_space<vmem>>, %arg2: memref<1x128xf32, #tpu.memory_space<vmem>>, %arg3: memref<1xf32, #tpu.memory_space<smem>>, %arg4: memref<1x1x8xf32, #tpu.memory_space<vmem>>) attributes {dimension_semantics = [#tpu.dimension_semantics<parallel>], iteration_bounds = array<i64: 1>, scalar_prefetch = 0 : i64, scratch_operands = 0 : i64, tpu.core_type = #tpu.core_type<tc>, window_params = [{transform_indices = @transform_0, window_bounds = array<i64: 8, 128>}, {pipeline_mode = #tpu.pipeline_mode<synchronous>, transform_indices = @transform_1, window_bounds = array<i64: 1, 128>}, {transform_indices = @transform_2, window_bounds = array<i64: 1>}, {transform_indices = @transform_3, window_bounds = array<i64: 1, 1, 8>}]} {
    %c0 = arith.constant 0 : index
    %c0_0 = arith.constant 0 : index
    %0 = vector.load %arg1[%c0, %c0_0] : memref<8x128xf32, #tpu.memory_space<vmem>>, vector<8x128xf32>
    %c0_1 = arith.constant 0 : index
    %c0_2 = arith.constant 0 : index
    %1 = vector.load %arg2[%c0_1, %c0_2] : memref<1x128xf32, #tpu.memory_space<vmem>>, vector<1x128xf32>
    %cst = arith.constant dense<0.000000e+00> : vector<1x8xf32>
    %2 = tpu.matmul %1, %0, %cst {dimension_numbers = #tpu.dot_dimension_numbers<[1], [1], [0], [0], [0, 0, 1, 0], [], []>} : vector<1x128xf32>, vector<8x128xf32>, vector<1x8xf32> -> vector<1x8xf32>
    %c0_3 = arith.constant 0 : index
    %3 = memref.load %arg3[%c0_3] : memref<1xf32, #tpu.memory_space<smem>>
    %4 = vector.broadcast %3 : f32 to vector<1x8xf32>
    %5 = arith.addf %2, %4 : vector<1x8xf32>
    %6 = vector.shape_cast %5 : vector<1x8xf32> to vector<1x1x8xf32>
    %c0_4 = arith.constant 0 : index
    %c0_5 = arith.constant 0 : index
    %c0_6 = arith.constant 0 : index
    %7 = vector.load %arg4[%c0_4, %c0_5, %c0_6] : memref<1x1x8xf32, #tpu.memory_space<vmem>>, vector<1x1x8xf32>
    tpu.vector_store %arg4[%c0_4, %c0_5, %c0_6], %6 {strides = array<i32>} : memref<1x1x8xf32, #tpu.memory_space<vmem>>, vector<1x1x8xf32>,
    return
  }
  func.func @transform_0(%arg0: i32) -> (i32, i32) {
    %c0_i32 = arith.constant 0 : i32
    %c0_i32_0 = arith.constant 0 : i32
    return %arg0, %c0_i32 : i32, i32
  }
  func.func @transform_1(%arg0: i32) -> (i32, i32) {
    %c0_i32 = arith.constant 0 : i32
    %c0_i32_0 = arith.constant 0 : i32
    %c0_i32_1 = arith.constant 0 : i32
    return %c0_i32, %c0_i32_0 : i32, i32
  }
  func.func @transform_2(%arg0: i32) -> i32 {
    %c0_i32 = arith.constant 0 : i32
    %c0_i32_0 = arith.constant 0 : i32
    return %c0_i32 : i32
  }
  func.func @transform_3(%arg0: i32) -> (i32, i32, i32) {
    %c0_i32 = arith.constant 0 : i32
    %c0_i32_0 = arith.constant 0 : i32
    %c0_i32_1 = arith.constant 0 : i32
    return %arg0, %c0_i32, %c0_i32_0 : i32, i32, i32
  }
}

</mosaic_0001>

<bundles_post_ra>
// kernel: tpu_custom_call.1
= control target key start
LH: loop header
LB: loop body
LE: loop exit
PB: predicated region body
PF: predicated region fallthrough
CT: control target
= control target key end

     0   :  { %9 = vsyncpa [#allocation4], 0  ;;  %s232_s0 = inlined_call_operand.hbm [shape: f32[8,128], index: 0, kind: input, shape index: {}]   ;;  %s233_s1 = inlined_call_operand.vmem [shape: f32[1,128], index: 1, kind: input, shape index: {}]   ;;  %s234_s2 = inlined_call_operand.<no memory space> [shape: f32[1], index: 2, kind: input, shape index: {}]   ;;  %s235_s3 = inlined_call_operand.hbm [shape: f32[1,1,8], index: 3, kind: output, shape index: {}]  }
   0x1   :  { %10 = vsyncpa [#allocation5], 0  ;;  %s178_s12 = smov [#allocation3]   ;;  %s130_s16 = scalar_lea.hbm %s232_s0, 128 }
   0x2   :  { %s17_s13 = sshll.u32 %s178_s12, 4  ;;  %p131_p0 = scmp.ne.s32.totalorder %s232_s0, %s130_s16  ;;  %s18_s13 = int_to_ptr.vmem [resolvable:$true] %s17_s13 }
   0x3   :  { %p134_p1 = scmp.lt.u32.totalorder %s130_s16, %s232_s0 }
   0x5   :  { %p136_p2 = pnand %p134_p1, %p131_p0 }
   0x7   :  { %139 = shalt.err (!%p136_p2)
}
   0x8   :  { %s140_s21 = scalar_lea.vmem %s18_s13, 128  ;;  %p145_p4 = scmp.lt.s32.totalorder %s18_s13, %s18_s13 }
   0x9   :  { %p141_p3 = scmp.ne.s32.totalorder %s18_s13, %s140_s21  ;;  %p146_p5 = scmp.lt.s32.totalorder %s140_s21, %s140_s21 }
   0xb   :  { %p147_p6 = por %p146_p5, %p145_p4 }
   0xd   :  { %p148_p7 = pnand %p147_p6, %p141_p3 }
   0xf   :  { %151 = shalt.err (!%p148_p7)
}
  0x10   :  { %20 = dma.hbm_to_vmem [thread:$0]  %s232_s0, 128, %s18_s13, [#allocation4]  }
  0x11   :  { %174 = dma.done.wait [#allocation4], 128  }
  0x12   :  { %175 = vsyncadd [#allocation4], 4294967168  ;;  %v179_v0 = vmov 0.0   ;;  %vm180_vm0 = vmmov 0   ;;  %v28_v1 = vld [vmem:[#allocation3] sm:$0xff]  ;;  %v31_v3 = vstv %s234_s2  ;;  %s181_s28 = smov [#allocation6]  }
  0x13   :  { %121 = vmatprep.subr.mxu0 %v179_v0  ;;  %123 = vmatprep.mubr.msk.f32.mxu0 %vm180_vm0, %v179_v0  ;;  %v29_v2 = vld [vmem:[%s233_s1] sm:$0x1]  ;;  %s110_s29 = sshll.u32 %s181_s28, 4  ;;  %vm102_vm1 = vcmask 57344   ;;  %s111_s29 = int_to_ptr.vmem [resolvable:$true] %s110_s29 }
  0x14   :  { %122 = vmatpush3.xpose.msra.mxu0 %v28_v1  ;;  %s152_s0 = scalar_lea.vmem %s111_s29, 16  ;;  %s156_s30 = scalar_lea.vmem %s111_s29, 32 }
  0x15   :  { %p153_p8 = scmp.ne.s32.totalorder %s111_s29, %s152_s0  ;;  %p157_p9 = scmp.lt.s32.totalorder %s111_s29, %s111_s29 }
  0x16   :  { %p158_p10 = scmp.lt.s32.totalorder %s156_s30, %s152_s0 }
  0x17   :  { %124 = vmatmul.mubr.f32.vlgmr.msra.gmra.mrb[0].mxu0 %v29_v2 }
  0x18   :  { %p159_p11 = por %p158_p10, %p157_p9 }
  0x1a   :  { %p160_p12 = pnand %p159_p11, %p153_p8 }
  0xea   :  { %v98_v4 = vpop.f32.mrb[0].mxu0 }
  0xeb   :  { %v99_v5 = vadd.f32 %v98_v4, %v31_v3  ;;  %v125_v6 = vpop.f32.mrb[1].mxu0 }
  0xed   :  { %103 = vst.msk [vmem:[#allocation6] sm:$0x1] %vm102_vm1, %v99_v5 }
  0xee   :  { %163 = shalt.err (!%p160_p12)
}
  0xef   :  { %s164_s2 = scalar_lea.hbm %s235_s3, 16 }
  0xf0   :  { %p165_p13 = scmp.ne.s32.totalorder %s235_s3, %s164_s2  ;;  %p168_p0 = scmp.lt.u32.totalorder %s164_s2, %s235_s3 }
  0xf2   :  { %p170_p1 = pnand %p168_p0, %p165_p13 }
  0xf4   :  { %173 = shalt.err (!%p170_p1)
}
  0xf5   :  { %113 = dma.vmem_to_hbm [thread:$0]  %s111_s29, 16, %s235_s3, [#allocation5]  }
  0xf6   :  { %176 = dma.done.wait [#allocation5], 16  }
  0xf7   :  { %177 = vsyncadd [#allocation5], 4294967280 }
  0xf8   :  { %117 = vsyncpa [#allocation4], 1 }
  0xf9   :  { %118 = vsyncpa [#allocation5], 1 }

</bundles_post_ra>
